<compile_context>
chip_gen: v7x
topology: tpu7x:2x2x1
jax: 0.10.0
libtpu: 0.0.40
codegen_flags: <defaults>
</compile_context>

<pallas_src>
import functools

import jax
import jax.numpy as jnp
from jax.experimental import pallas as pl
from jax.experimental.pallas import tpu as pltpu

_MiB = 1024 * 1024


def _round_up(a, b):
    return (a + b - 1) // b * b


def _vmem_capacity_bytes():
    """Physical VMEM per core (128 MiB v5e/v6e, 64 MiB v7x); conservative fallback."""
    try:
        cap = getattr(pltpu.get_tpu_info(), "vmem_capacity_bytes", None)
        if cap:
            return int(cap)
    except Exception:
        pass
    return 64 * _MiB


def _attention_from_pools(avg_col, max_col, w1, w2):
    """softsign(fc2(relu(fc1(avg))) + fc2(relu(fc1(max)))) as a (C, 1) f32 column.

    avg_col, max_col: (C, 1) f32.  w1: (hidden, C) f32.  w2: (C, hidden) f32.
    Both branches are evaluated with a single dot per FC layer by stacking the
    two pooled vectors as the two columns of a (C, 2) tile.
    """
    c = avg_col.shape[0]
    col = jax.lax.broadcasted_iota(jnp.int32, (c, 2), 1)
    pools = jnp.where(col == 0, avg_col, max_col)                # (C, 2)
    h = jnp.dot(w1, pools, preferred_element_type=jnp.float32)   # (hidden, 2) fc1
    h = jnp.maximum(h, 0.0)                                      # ReLU (per branch)
    z2 = jnp.dot(w2, h, preferred_element_type=jnp.float32)      # (C, 2)      fc2
    z = z2[:, 0:1] + z2[:, 1:2]                                  # avg-branch + max-branch
    return z / (1.0 + jnp.abs(z))                                # Softsign


# ---------------------------------------------------------------------------
# Path 1: fused single-pass slab kernel (whole (C, HWp) per batch element).
# ---------------------------------------------------------------------------
def _fused_kernel(x_ref, w1_ref, w2_ref, o_ref, *, hw_valid, needs_mask):
    # x_ref / o_ref: (B_TILE, C, HWp) native dtype; w1: (hidden, C); w2: (C, hidden)
    b_tile, c, hwp = x_ref.shape
    w1 = w1_ref[...]
    w2 = w2_ref[...]
    inv_hw = jnp.float32(1.0 / hw_valid)

    for b in range(b_tile):                       # static unroll over packed batches
        x = x_ref[b].astype(jnp.float32)          # (C, HWp) -> f32 math
        # padded lanes hold zeros, so the sum is exact
        avg = jnp.sum(x, axis=-1, keepdims=True) * inv_hw            # (C, 1)
        if needs_mask:
            lane = jax.lax.broadcasted_iota(jnp.int32, (c, hwp), 1)
            x_for_max = jnp.where(lane < hw_valid, x, -jnp.inf)
        else:
            x_for_max = x
        mx = jnp.max(x_for_max, axis=-1, keepdims=True)              # (C, 1)
        att = _attention_from_pools(avg, mx, w1, w2)                 # (C, 1) f32
        o_ref[b] = (att * x).astype(o_ref.dtype)


# ---------------------------------------------------------------------------
# Path 2a: tiled pool + attention kernel (grid (N, HW_tiles), HW axis arbitrary).
# ---------------------------------------------------------------------------
def _pool_attention_kernel(x_ref, w1_ref, w2_ref, att_ref, sum_acc, max_acc,
                           *, hw_valid, tile_hw, needs_mask):
    t = pl.program_id(1)

    @pl.when(t == 0)
    def _():
        sum_acc[...] = jnp.zeros_like(sum_acc)
        max_acc[...] = jnp.full_like(max_acc, -jnp.inf)

    x = x_ref[0].astype(jnp.float32)                       # (C, TILE) f32
    # padded lanes are zeros -> safe for the running sum
    sum_acc[...] += jnp.sum(x, axis=-1, keepdims=True)
    if needs_mask:
        lane = jax.lax.broadcasted_iota(jnp.int32, x.shape, 1) + t * tile_hw
        x = jnp.where(lane < hw_valid, x, -jnp.inf)
    max_acc[...] = jnp.maximum(max_acc[...], jnp.max(x, axis=-1, keepdims=True))

    @pl.when(t == pl.num_programs(1) - 1)
    def _():
        avg = sum_acc[...] * jnp.float32(1.0 / hw_valid)
        att_ref[0] = _attention_from_pools(avg, max_acc[...], w1_ref[...], w2_ref[...])


# ---------------------------------------------------------------------------
# Path 2b: elementwise gate kernel, lane-dense tiles, fully parallel grid.
# ---------------------------------------------------------------------------
def _gate_kernel(att_ref, x_ref, o_ref):
    att = att_ref[0]                                       # (C, 1) f32
    x = x_ref[0].astype(jnp.float32)                       # (C, TILE)
    o_ref[0] = (att * x).astype(o_ref.dtype)


# ---------------------------------------------------------------------------
# Wrapper
# ---------------------------------------------------------------------------
def channel_attention(x, w1, w2, *, force_two_pass=False, tile_hw=None):
    """x: (N, C, H, W) any float dtype (bf16/f32); w1: (hidden, C); w2: (C, hidden)."""
    N, C, H, W = x.shape
    HW = H * W
    hidden = w1.shape[0]
    itemsize = jnp.dtype(x.dtype).itemsize

    w1f = jnp.asarray(w1, jnp.float32)      # (hidden, C)  fc1 weight
    w2f = jnp.asarray(w2, jnp.float32)      # (C, hidden)  fc2 weight

    cap = _vmem_capacity_bytes()
    budget = max(cap - 16 * _MiB, 16 * _MiB)        # headroom under physical VMEM

    hw128 = _round_up(HW, 128)                      # lane-dense last dim
    # double-buffered input + output (native dtype) + f32 temporaries, per batch
    per_batch_bytes = C * hw128 * (4 * itemsize + 8)
    use_fused = (not force_two_pass) and per_batch_bytes <= budget

    def pad_to(hwp):
        x_flat = x.reshape(N, C, HW)
        if hwp != HW:
            x_flat = jnp.pad(x_flat, ((0, 0), (0, 0), (0, hwp - HW)))
        return x_flat

    if use_fused:
        hwp = hw128
        # pack several batch elements per grid step (amortize per-step overhead)
        b_tile = 1
        for d in range(1, min(N, 8) + 1):
            if N % d == 0 and d * per_batch_bytes <= budget:
                b_tile = d
        x_flat = pad_to(hwp)
        vmem_limit = int(max(32 * _MiB,
                             min(cap - 8 * _MiB, b_tile * per_batch_bytes + 32 * _MiB)))
        kernel = functools.partial(_fused_kernel, hw_valid=HW,
                                   needs_mask=(hwp != HW))
        out = pl.pallas_call(
            kernel,
            out_shape=jax.ShapeDtypeStruct((N, C, hwp), x.dtype),
            grid_spec=pltpu.PrefetchScalarGridSpec(
                num_scalar_prefetch=0,
                grid=(N // b_tile,),
                in_specs=[
                    pl.BlockSpec((b_tile, C, hwp), lambda b: (b, 0, 0)),
                    pl.BlockSpec((hidden, C), lambda b: (0, 0)),
                    pl.BlockSpec((C, hidden), lambda b: (0, 0)),
                ],
                out_specs=pl.BlockSpec((b_tile, C, hwp), lambda b: (b, 0, 0)),
            ),
            compiler_params=pltpu.CompilerParams(
                dimension_semantics=("parallel",),
                vmem_limit_bytes=vmem_limit),
        )(x_flat, w1f, w2f)
    else:
        # lane-dense HW tile (multiple of 128) bounded by a small VMEM budget
        if tile_hw is None:
            per_elem = 4 * itemsize + 8
            max_tile = max(128, (16 * _MiB // (C * per_elem)) // 128 * 128)
            tile = min(hw128, 1024, max_tile)
        else:
            assert tile_hw % 128 == 0, "tile_hw must be a multiple of 128"
            tile = min(tile_hw, hw128)
        hwp = _round_up(HW, tile)
        n_tiles = hwp // tile
        x_flat = pad_to(hwp)
        vmem_limit = int(min(cap - 8 * _MiB, 48 * _MiB))

        pool_kernel = functools.partial(
            _pool_attention_kernel, hw_valid=HW, tile_hw=tile,
            needs_mask=(hwp != HW))
        att = pl.pallas_call(
            pool_kernel,
            out_shape=jax.ShapeDtypeStruct((N, C, 1), jnp.float32),
            grid_spec=pltpu.PrefetchScalarGridSpec(
                num_scalar_prefetch=0,
                grid=(N, n_tiles),
                in_specs=[
                    pl.BlockSpec((1, C, tile), lambda b, t: (b, 0, t)),
                    pl.BlockSpec((hidden, C), lambda b, t: (0, 0)),
                    pl.BlockSpec((C, hidden), lambda b, t: (0, 0)),
                ],
                out_specs=pl.BlockSpec((1, C, 1), lambda b, t: (b, 0, 0)),
                scratch_shapes=[pltpu.VMEM((C, 1), jnp.float32),
                                pltpu.VMEM((C, 1), jnp.float32)],
            ),
            compiler_params=pltpu.CompilerParams(
                dimension_semantics=("parallel", "arbitrary"),
                vmem_limit_bytes=vmem_limit),
        )(x_flat, w1f, w2f)

        out = pl.pallas_call(
            _gate_kernel,
            out_shape=jax.ShapeDtypeStruct((N, C, hwp), x.dtype),
            grid_spec=pltpu.PrefetchScalarGridSpec(
                num_scalar_prefetch=0,
                grid=(N, n_tiles),
                in_specs=[
                    pl.BlockSpec((1, C, 1), lambda b, t: (b, 0, 0)),
                    pl.BlockSpec((1, C, tile), lambda b, t: (b, 0, t)),
                ],
                out_specs=pl.BlockSpec((1, C, tile), lambda b, t: (b, 0, t)),
            ),
            compiler_params=pltpu.CompilerParams(
                dimension_semantics=("parallel", "parallel"),
                vmem_limit_bytes=vmem_limit),
        )(att, x_flat)

    if hwp != HW:
        out = out[:, :, :HW]
    return out.reshape(N, C, H, W)


def channel_attention_ref(x, w1, w2):
    """Pure-JAX reference mirroring the PyTorch forward."""
    avg = jnp.mean(x, axis=(2, 3), keepdims=True)   # AdaptiveAvgPool2d(1)
    mx = jnp.max(x, axis=(2, 3), keepdims=True)     # AdaptiveMaxPool2d(1)

    def branch(p):
        h = jnp.einsum('oc,ncij->noij', w1, p)      # fc1 (1x1 conv, no bias)
        h = jnp.maximum(h, 0.0)                     # ReLU
        return jnp.einsum('co,noij->ncij', w2, h)   # fc2 (1x1 conv, no bias)

    out = branch(avg) + branch(mx)
    return out / (1.0 + jnp.abs(out)) * x           # Softsign * x


if __name__ == "__main__":
    N, C, H, W = 2, 16, 16, 16
    ratio = 8
    hidden = max(C // ratio, 1)

    key = jax.random.PRNGKey(0)
    kx, k1, k2 = jax.random.split(key, 3)

    x = jax.random.normal(kx, (N, C, H, W), dtype=jnp.float32)
    # Conv2d 1x1 weights (no bias), squeezed from (out, in, 1, 1) to (out, in)
    w1 = jax.random.normal(k1, (hidden, C), dtype=jnp.float32) * 0.2   # fc1
    w2 = jax.random.normal(k2, (C, hidden), dtype=jnp.float32) * 0.2   # fc2

    ref = channel_attention_ref(x, w1, w2)

    # 1) fused single-pass slab path (batches packed per grid step)
    out = jax.block_until_ready(channel_attention(x, w1, w2))
    assert out.shape == (N, C, H, W) and out.dtype == x.dtype
    assert jnp.allclose(out, ref, atol=1e-5, rtol=1e-5), \
        f"fused path max abs err {jnp.max(jnp.abs(out - ref))}"

    # 2) forced two-pass (pool+attention, then gate) path with multiple HW tiles
    out2 = jax.block_until_ready(
        channel_attention(x, w1, w2, force_two_pass=True, tile_hw=128))
    assert jnp.allclose(out2, ref, atol=1e-5, rtol=1e-5), \
        f"two-pass path max abs err {jnp.max(jnp.abs(out2 - ref))}"

    # 3) native bf16 activations + non-multiple-of-128 spatial (lane padding/mask)
    xb = jax.random.normal(kx, (N, C, 12, 12), dtype=jnp.float32).astype(jnp.bfloat16)
    refb = channel_attention_ref(xb.astype(jnp.float32), w1, w2)
    outb = jax.block_until_ready(channel_attention(xb, w1, w2))
    assert outb.dtype == jnp.bfloat16
    assert jnp.allclose(outb.astype(jnp.float32), refb, atol=3e-2, rtol=3e-2), \
        f"bf16 path max abs err {jnp.max(jnp.abs(outb.astype(jnp.float32) - refb))}"

    print("KERNEL_OK")
</pallas_src>

<mosaic_0001>
module attributes {stable_mosaic.version = 11 : i64} {
  func.func @_fused_kernel(%arg0: i32, %arg1: memref<2x16x256xf32, #tpu.memory_space<vmem>>, %arg2: memref<2x16xf32, #tpu.memory_space<vmem>>, %arg3: memref<16x2xf32, #tpu.memory_space<vmem>>, %arg4: memref<2x16x256xf32, #tpu.memory_space<vmem>>) attributes {dimension_semantics = [#tpu.dimension_semantics<parallel>], iteration_bounds = array<i64: 1>, scalar_prefetch = 0 : i64, scratch_operands = 0 : i64, tpu.core_type = #tpu.core_type<tc>, window_params = [{transform_indices = @transform_0, window_bounds = array<i64: 2, 16, 256>}, {pipeline_mode = #tpu.pipeline_mode<synchronous>, transform_indices = @transform_1, window_bounds = array<i64: 2, 16>}, {pipeline_mode = #tpu.pipeline_mode<synchronous>, transform_indices = @transform_2, window_bounds = array<i64: 16, 2>}, {transform_indices = @transform_3, window_bounds = array<i64: 2, 16, 256>}]} {
    %c0 = arith.constant 0 : index
    %c0_0 = arith.constant 0 : index
    %0 = vector.load %arg2[%c0, %c0_0] : memref<2x16xf32, #tpu.memory_space<vmem>>, vector<2x16xf32>
    %c0_1 = arith.constant 0 : index
    %c0_2 = arith.constant 0 : index
    %1 = vector.load %arg3[%c0_1, %c0_2] : memref<16x2xf32, #tpu.memory_space<vmem>>, vector<16x2xf32>
    %c0_3 = arith.constant 0 : index
    %c0_4 = arith.constant 0 : index
    %c0_5 = arith.constant 0 : index
    %2 = vector.load %arg1[%c0_3, %c0_4, %c0_5] : memref<2x16x256xf32, #tpu.memory_space<vmem>>, vector<1x16x256xf32>
    %3 = vector.shape_cast %2 : vector<1x16x256xf32> to vector<16x256xf32>
    %cst = arith.constant dense<0.000000e+00> : vector<16xf32>
    %4 = vector.multi_reduction <add>, %3, %cst [1] : vector<16x256xf32> to vector<16xf32>
    %5 = vector.shape_cast %4 : vector<16xf32> to vector<16x1xf32>
    %cst_6 = arith.constant 3.906250e-03 : f32
    %6 = vector.broadcast %cst_6 : f32 to vector<16x1xf32>
    %7 = arith.mulf %5, %6 : vector<16x1xf32>
    %cst_7 = arith.constant dense<0xFF800000> : vector<16xf32>
    %8 = vector.multi_reduction <maximumf>, %3, %cst_7 [1] : vector<16x256xf32> to vector<16xf32>
    %9 = vector.shape_cast %8 : vector<16xf32> to vector<16x1xf32>
    %10 = tpu.iota {dimensions = array<i32: 1>} : vector<16x2xi32>
    %c0_i32 = arith.constant 0 : i32
    %11 = vector.broadcast %c0_i32 : i32 to vector<16x2xi32>
    %12 = arith.cmpi eq, %10, %11 : vector<16x2xi32>
    %13 = vector.shape_cast %7 : vector<16x1xf32> to vector<16x1xf32>
    %14 = vector.broadcast %13 : vector<16x1xf32> to vector<16x2xf32>
    %15 = vector.shape_cast %9 : vector<16x1xf32> to vector<16x1xf32>
    %16 = vector.broadcast %15 : vector<16x1xf32> to vector<16x2xf32>
    %17 = arith.select %12, %14, %16 : vector<16x2xi1>, vector<16x2xf32>
    %cst_8 = arith.constant dense<0.000000e+00> : vector<2x2xf32>
    %18 = tpu.matmul %0, %17, %cst_8 {dimension_numbers = #tpu.dot_dimension_numbers<[1], [0], [0], [1], [0, 0, 1, 1], [], []>} : vector<2x16xf32>, vector<16x2xf32>, vector<2x2xf32> -> vector<2x2xf32>
    %cst_9 = arith.constant 0.000000e+00 : f32
    %19 = vector.broadcast %cst_9 : f32 to vector<2x2xf32>
    %20 = arith.maximumf %18, %19 : vector<2x2xf32>
    %cst_10 = arith.constant dense<0.000000e+00> : vector<16x2xf32>
    %21 = tpu.matmul %1, %20, %cst_10 {dimension_numbers = #tpu.dot_dimension_numbers<[1], [0], [0], [1], [0, 0, 1, 1], [], []>} : vector<16x2xf32>, vector<2x2xf32>, vector<16x2xf32> -> vector<16x2xf32>
    %22 = vector.extract_strided_slice %21 {offsets = [0, 0], sizes = [16, 1], strides = [1, 1]} : vector<16x2xf32> to vector<16x1xf32>
    %23 = vector.extract_strided_slice %21 {offsets = [0, 1], sizes = [16, 1], strides = [1, 1]} : vector<16x2xf32> to vector<16x1xf32>
    %24 = arith.addf %22, %23 : vector<16x1xf32>
    %25 = math.absf %24 : vector<16x1xf32>
    %cst_11 = arith.constant 1.000000e+00 : f32
    %26 = vector.broadcast %cst_11 : f32 to vector<16x1xf32>
    %27 = arith.addf %26, %25 : vector<16x1xf32>
    %28 = arith.divf %24, %27 : vector<16x1xf32>
    %29 = vector.broadcast %28 : vector<16x1xf32> to vector<16x256xf32>
    %30 = arith.mulf %29, %3 : vector<16x256xf32>
    %c0_12 = arith.constant 0 : index
    %c0_13 = arith.constant 0 : index
    %c0_14 = arith.constant 0 : index
    %31 = vector.load %arg4[%c0_12, %c0_13, %c0_14] : memref<2x16x256xf32, #tpu.memory_space<vmem>>, vector<1x16x256xf32>
    %32 = vector.shape_cast %31 : vector<1x16x256xf32> to vector<16x256xf32>
    %33 = vector.shape_cast %30 : vector<16x256xf32> to vector<1x16x256xf32>
    tpu.vector_store %arg4[%c0_12, %c0_13, %c0_14], %33 {strides = array<i32>} : memref<2x16x256xf32, #tpu.memory_space<vmem>>, vector<1x16x256xf32>,
    %c1 = arith.constant 1 : index
    %c0_15 = arith.constant 0 : index
    %c0_16 = arith.constant 0 : index
    %34 = vector.load %arg1[%c1, %c0_15, %c0_16] : memref<2x16x256xf32, #tpu.memory_space<vmem>>, vector<1x16x256xf32>
    %35 = vector.shape_cast %34 : vector<1x16x256xf32> to vector<16x256xf32>
    %cst_17 = arith.constant dense<0.000000e+00> : vector<16xf32>
    %36 = vector.multi_reduction <add>, %35, %cst_17 [1] : vector<16x256xf32> to vector<16xf32>
    %37 = vector.shape_cast %36 : vector<16xf32> to vector<16x1xf32>
    %cst_18 = arith.constant 3.906250e-03 : f32
    %38 = vector.broadcast %cst_18 : f32 to vector<16x1xf32>
    %39 = arith.mulf %37, %38 : vector<16x1xf32>
    %cst_19 = arith.constant dense<0xFF800000> : vector<16xf32>
    %40 = vector.multi_reduction <maximumf>, %35, %cst_19 [1] : vector<16x256xf32> to vector<16xf32>
    %41 = vector.shape_cast %40 : vector<16xf32> to vector<16x1xf32>
    %42 = tpu.iota {dimensions = array<i32: 1>} : vector<16x2xi32>
    %c0_i32_20 = arith.constant 0 : i32
    %43 = vector.broadcast %c0_i32_20 : i32 to vector<16x2xi32>
    %44 = arith.cmpi eq, %42, %43 : vector<16x2xi32>
    %45 = vector.shape_cast %39 : vector<16x1xf32> to vector<16x1xf32>
    %46 = vector.broadcast %45 : vector<16x1xf32> to vector<16x2xf32>
    %47 = vector.shape_cast %41 : vector<16x1xf32> to vector<16x1xf32>
    %48 = vector.broadcast %47 : vector<16x1xf32> to vector<16x2xf32>
    %49 = arith.select %44, %46, %48 : vector<16x2xi1>, vector<16x2xf32>
    %cst_21 = arith.constant dense<0.000000e+00> : vector<2x2xf32>
    %50 = tpu.matmul %0, %49, %cst_21 {dimension_numbers = #tpu.dot_dimension_numbers<[1], [0], [0], [1], [0, 0, 1, 1], [], []>} : vector<2x16xf32>, vector<16x2xf32>, vector<2x2xf32> -> vector<2x2xf32>
    %cst_22 = arith.constant 0.000000e+00 : f32
    %51 = vector.broadcast %cst_22 : f32 to vector<2x2xf32>
    %52 = arith.maximumf %50, %51 : vector<2x2xf32>
    %cst_23 = arith.constant dense<0.000000e+00> : vector<16x2xf32>
    %53 = tpu.matmul %1, %52, %cst_23 {dimension_numbers = #tpu.dot_dimension_numbers<[1], [0], [0], [1], [0, 0, 1, 1], [], []>} : vector<16x2xf32>, vector<2x2xf32>, vector<16x2xf32> -> vector<16x2xf32>
    %54 = vector.extract_strided_slice %53 {offsets = [0, 0], sizes = [16, 1], strides = [1, 1]} : vector<16x2xf32> to vector<16x1xf32>
    %55 = vector.extract_strided_slice %53 {offsets = [0, 1], sizes = [16, 1], strides = [1, 1]} : vector<16x2xf32> to vector<16x1xf32>
    %56 = arith.addf %54, %55 : vector<16x1xf32>
    %57 = math.absf %56 : vector<16x1xf32>
    %cst_24 = arith.constant 1.000000e+00 : f32
    %58 = vector.broadcast %cst_24 : f32 to vector<16x1xf32>
    %59 = arith.addf %58, %57 : vector<16x1xf32>
    %60 = arith.divf %56, %59 : vector<16x1xf32>
    %61 = vector.broadcast %60 : vector<16x1xf32> to vector<16x256xf32>
    %62 = arith.mulf %61, %35 : vector<16x256xf32>
    %c1_25 = arith.constant 1 : index
    %c0_26 = arith.constant 0 : index
    %c0_27 = arith.constant 0 : index
    %63 = vector.load %arg4[%c1_25, %c0_26, %c0_27] : memref<2x16x256xf32, #tpu.memory_space<vmem>>, vector<1x16x256xf32>
    %64 = vector.shape_cast %63 : vector<1x16x256xf32> to vector<16x256xf32>
    %65 = vector.shape_cast %62 : vector<16x256xf32> to vector<1x16x256xf32>
    tpu.vector_store %arg4[%c1_25, %c0_26, %c0_27], %65 {strides = array<i32>} : memref<2x16x256xf32, #tpu.memory_space<vmem>>, vector<1x16x256xf32>,
    return
  }
  func.func @transform_0(%arg0: i32) -> (i32, i32, i32) {
    %c0_i32 = arith.constant 0 : i32
    %c0_i32_0 = arith.constant 0 : i32
    %c0_i32_1 = arith.constant 0 : i32
    return %arg0, %c0_i32, %c0_i32_0 : i32, i32, i32
  }
  func.func @transform_1(%arg0: i32) -> (i32, i32) {
    %c0_i32 = arith.constant 0 : i32
    %c0_i32_0 = arith.constant 0 : i32
    %c0_i32_1 = arith.constant 0 : i32
    return %c0_i32, %c0_i32_0 : i32, i32
  }
  func.func @transform_2(%arg0: i32) -> (i32, i32) {
    %c0_i32 = arith.constant 0 : i32
    %c0_i32_0 = arith.constant 0 : i32
    %c0_i32_1 = arith.constant 0 : i32
    return %c0_i32, %c0_i32_0 : i32, i32
  }
  func.func @transform_3(%arg0: i32) -> (i32, i32, i32) {
    %c0_i32 = arith.constant 0 : i32
    %c0_i32_0 = arith.constant 0 : i32
    %c0_i32_1 = arith.constant 0 : i32
    return %arg0, %c0_i32, %c0_i32_0 : i32, i32, i32
  }
}

</mosaic_0001>

<bundles_post_ra>
// kernel: tpu_custom_call.1
= control target key start
LH: loop header
LB: loop body
LE: loop exit
PB: predicated region body
PF: predicated region fallthrough
CT: control target
= control target key end

     0   :  { %8 = vsyncpa [#allocation3], 0  ;;  %s717_s0 = inlined_call_operand.hbm [shape: f32[2,16,256], index: 0, kind: input, shape index: {}]   ;;  %s718_s1 = inlined_call_operand.vmem [shape: f32[2,16], index: 1, kind: input, shape index: {}]   ;;  %s719_s2 = inlined_call_operand.vmem [shape: f32[16,2], index: 2, kind: input, shape index: {}]   ;;  %s720_s3 = inlined_call_operand.hbm [shape: f32[2,16,256], index: 3, kind: output, shape index: {}]  }
   0x1   :  { %9 = vsyncpa [#allocation4], 0  ;;  %s593_s12 = smov [#allocation2]   ;;  %s545_s16 = scalar_lea.hbm %s717_s0, 1024 }
   0x2   :  { %s15_s13 = sshll.u32 %s593_s12, 4  ;;  %p546_p0 = scmp.ne.s32.totalorder %s717_s0, %s545_s16  ;;  %s16_s13 = int_to_ptr.vmem [resolvable:$true] %s15_s13 }
   0x3   :  { %p549_p1 = scmp.lt.u32.totalorder %s545_s16, %s717_s0 }
   0x5   :  { %p551_p2 = pnand %p549_p1, %p546_p0 }
   0x7   :  { %554 = shalt.err (!%p551_p2)
}
   0x8   :  { %s555_s21 = scalar_lea.vmem %s16_s13, 1024  ;;  %p560_p4 = scmp.lt.s32.totalorder %s16_s13, %s16_s13 }
   0x9   :  { %p556_p3 = scmp.ne.s32.totalorder %s16_s13, %s555_s21  ;;  %p561_p5 = scmp.lt.s32.totalorder %s555_s21, %s555_s21 }
   0xb   :  { %p562_p6 = por %p561_p5, %p560_p4 }
   0xd   :  { %p563_p7 = pnand %p562_p6, %p556_p3 }
   0xf   :  { %566 = shalt.err (!%p563_p7)
}
  0x10   :  { %s594_s22 = smov 256   ;;  %s595_s23 = smov 16  }
  0x11   :  { %21 = dma.hbm_to_vmem [thread:$0]  %s717_s0, 1024, %s16_s13, [#allocation3], %s594_s22, %s594_s22, %s595_s23  }
  0x12   :  { %589 = dma.done.wait [#allocation3], 1024  }
  0x13   :  { %590 = vsyncadd [#allocation3], 4294966272  ;;  %v637_v0 = vld [vmem:[#allocation2] sm:$0xff]  ;;  %v639_v1 = vld [vmem:[#allocation2 + $0x8] sm:$0xff]  ;;  %v596_v8 = vmov 0.0|0.0   ;;  %vm597_vm0 = vmmov 0   ;;  %v50_v18 = vlaneseq }
  0x14   :  { %v641_v2 = vld [vmem:[#allocation2 + $0x10] sm:$0xff]  ;;  %v36_v3 = vadd.f32 %v639_v1, %v637_v0  ;;  %v44_v4 = vmax.f32 %v637_v0, %v639_v1  ;;  %v647_v5 = vld [vmem:[#allocation2 + $0x18] sm:$0xff]  ;;  %520 = vmatprep.subr.bf16.mxu0 %v596_v8  ;;  %v598_v9 = vmov 0.0   ;;  %v658_v12 = vld [vmem:[#allocation2 + $0x20] sm:$0xff]  ;;  %vm55_vm2 = vcmask 130048   ;;  %s599_s30 = smov 127  }
  0x15   :  { %v39_v6 = vadd.f32 %v647_v5, %v641_v2  ;;  %v47_v7 = vmax.f32 %v641_v2, %v647_v5  ;;  %500 = vmatprep.mubr.msk.f32.mxu0 %vm597_vm0, %v598_v9  ;;  %v654_v10 = vld [vmem:[#allocation2 + $0x30] sm:$0xff]  ;;  %v656_v11 = vld [vmem:[#allocation2 + $0x38] sm:$0xff]  ;;  %v662_v14 = vld [vmem:[#allocation2 + $0x28] sm:$0xff]  ;;  %v51_v20 = vand.u32 127, %v50_v18  ;;  %vm130_vm3 = vcmask 15360  }
  0x16   :  { %37 = vadd.xlane.f32.xlu0 %v36_v3  ;;  %45 = vmax.xlane.f32.xlu1 %v44_v4  ;;  %v260_v13 = vadd.f32 %v656_v11, %v654_v10  ;;  %v257_v15 = vadd.f32 %v662_v14, %v658_v12  ;;  %v268_v16 = vmax.f32 %v654_v10, %v656_v11  ;;  %v29_v29 = vld [vmem:[%s718_s1] sm:$0x3]  ;;  %vm137_vm4 = vcmask 1041408   ;;  %v31_v42 = vld [vmem:[%s719_s2 + $0x8] sm:$0xff] }
  0x17   :  { %v265_v17 = vmax.f32 %v658_v12, %v662_v14  ;;  %vm52_vm1 = vcmp.eq.s32.totalorder %v51_v20, 0  ;;  %v30_v30 = vld [vmem:[%s719_s2] sm:$0xff]  ;;  %v600_v49 = vmov 0   ;;  %s601_s2 = smov [#allocation5]  }
  0x18   :  { %505 = vmatprep.mubr.msk.f32.mxu1 %vm130_vm3, %v30_v30  ;;  %535 = vset.pattern.permute.xlu0 %v600_v49  ;;  %s464_s4 = sshll.u32 %s601_s2, 4  ;;  %s465_s4 = int_to_ptr.vmem [resolvable:$true] %s464_s4 }
  0x19   :  { %536 = vset.pattern.permute.xlu1 %v600_v49  ;;  %s567_s5 = scalar_lea.vmem %s465_s4, 1024  ;;  %p572_p9 = scmp.lt.s32.totalorder %s465_s4, %s465_s4 }
  0x1a   :  { %40 = vadd.xlane.f32.xlu0 %v39_v6  ;;  %48 = vmax.xlane.f32.xlu1 %v47_v7  ;;  %p568_p8 = scmp.ne.s32.totalorder %s465_s4, %s567_s5  ;;  %p573_p10 = scmp.lt.s32.totalorder %s567_s5, %s567_s5 }
  0x1c   :  { %p574_p11 = por %p573_p10, %p572_p9 }
  0x1e   :  { %261 = vadd.xlane.f32.xlu1 %v260_v13  ;;  %258 = vadd.xlane.f32.xlu0 %v257_v15  ;;  %p575_p12 = pnand %p574_p11, %p568_p8 }
  0x22   :  { %269 = vmax.xlane.f32.xlu1 %v268_v16  ;;  %266 = vmax.xlane.f32.xlu0 %v265_v17 }
  0xa3   :  { %v38_v19 = vpop.xlane.xlu0 %37  ;;  %v46_v21 = vpop.xlane.xlu1 %45 }
  0xa4   :  { %v42_v22 = vmul.f32 0.00390625, %v38_v19 }
  0xa6   :  { %v53_v26 = vsel %vm52_vm1, %v42_v22, %v46_v21 }
  0xa7   :  { %v41_v23 = vpop.xlane.xlu0 %40  ;;  %v49_v24 = vpop.xlane.xlu1 %48 }
  0xa8   :  { %v43_v25 = vmul.f32 0.00390625, %v41_v23 }
  0xaa   :  { %v54_v27 = vsel %vm52_vm1, %v43_v25, %v49_v24 }
  0xab   :  { %v521_v28 = vpack.c.bf16 %v54_v27, %v53_v26  ;;  %v262_v31 = vpop.xlane.xlu1 %261  ;;  %v259_v32 = vpop.xlane.xlu0 %258 }
  0xac   :  { %v264_v33 = vmul.f32 0.00390625, %v262_v31  ;;  %v263_v34 = vmul.f32 0.00390625, %v259_v32 }
  0xad   :  { %522 = vmatpush3.bf16.msra.mxu0 %v521_v28 }
  0xaf   :  { %v270_v35 = vpop.xlane.xlu1 %269  ;;  %v267_v36 = vpop.xlane.xlu0 %266 }
  0xb0   :  { %501 = vmatmul.mubr.msk.f32.vlgmr.msra.gmra.mrb[0].mxu0 %vm55_vm2, %v29_v29  ;;  %v272_v38 = vsel %vm52_vm1, %v264_v33, %v270_v35  ;;  %v271_v39 = vsel %vm52_vm1, %v263_v34, %v267_v36 }
  0xb1   :  { %517 = vmatprep.mubr.msk.f32.mxu0 %vm130_vm3, %v30_v30  ;;  %v524_v43 = vpack.c.bf16 %v272_v38, %v271_v39 }
 0x183   :  { %v125_v37 = vpop.f32.mrb[0].mxu0 }
 0x184   :  { %v129_v40 = vmax.f32 %v125_v37, 0.0  ;;  %v502_v41 = vpop.f32.mrb[1].mxu0 }
 0x186   :  { %503 = vmatprep.subr.msk.mxu1 %vm137_vm4, %v129_v40 }
 0x187   :  { %504 = vmatpush3.msk.msra.mxu1 %vm137_vm4, %v129_v40 }
 0x188   :  { %506 = vmatmul.mubr.msk.f32.vlgmr.msra.gmra.mrb[0].mxu1 %vm130_vm3, %v31_v42  ;;  %523 = vmatprep.subr.bf16.mxu1 %v596_v8 }
 0x189   :  { %525 = vmatpush3.bf16.msra.mxu1 %v524_v43  ;;  %512 = vmatprep.mubr.msk.f32.mxu1 %vm597_vm0, %v598_v9 }
 0x18c   :  { %513 = vmatmul.mubr.msk.f32.vlgmr.msra.gmra.mrb[2].mxu1 %vm55_vm2, %v29_v29 }
 0x25b   :  { %v507_v44 = vpop.f32.mrb[0].mxu1 }
 0x25c   :  { %220 = vrot.lane.b32.xlu1 %v507_v44, %s599_s30  ;;  %v207_v45 = vpop.f32.mrb[1].mxu1 }
 0x25d   :  { %218 = vrot.lane.b32.xlu0 %v207_v45, %s599_s30 }
 0x25f   :  { %v339_v46 = vpop.f32.mrb[2].mxu1 }
 0x260   :  { %v343_v47 = vmax.f32 %v339_v46, 0.0  ;;  %v514_v48 = vpop.f32.mrb[3].mxu1 }
 0x262   :  { %515 = vmatprep.subr.msk.mxu0 %vm137_vm4, %v343_v47 }
 0x263   :  { %516 = vmatpush3.msk.msra.mxu0 %vm137_vm4, %v343_v47 }
 0x264   :  { %518 = vmatmul.mubr.msk.f32.vlgmr.msra.gmra.mrb[2].mxu0 %vm130_vm3, %v31_v42 }
 0x2ce   :  { %v221_v56 = vpop.permute.xlu1 %220 }
 0x2cf   :  { %v219_v50 = vpop.permute.xlu0 %218  ;;  %v225_v57 = vadd.f32 %v507_v44, %v221_v56 }
 0x2d0   :  { %v224_v51 = vadd.f32 %v219_v50, %v207_v45 }
 0x2d1   :  { %v227_v58 = vand.u32 2147483647, %v225_v57 }
 0x2d2   :  { %v226_v52 = vand.u32 2147483647, %v224_v51 }
 0x2d3   :  { %v229_v59 = vadd.f32 1.0, %v227_v58 }
 0x2d4   :  { %v228_v53 = vadd.f32 1.0, %v226_v52 }
 0x2d6   :  { %537 = vrcp.f32 %v228_v53 }
 0x2d7   :  { %539 = vrcp.f32 %v229_v59 }
 0x2e0   :  { %v538_v54 = vpop.eup %537 }
 0x2e1   :  { %v231_v55 = vmul.f32 %v538_v54, %v224_v51  ;;  %v540_v62 = vpop.eup %539 }
 0x2e2   :  { %v233_v63 = vmul.f32 %v540_v62, %v225_v57 }
 0x2e3   :  { %236 = vperm.xlu0 %535, %v231_v55  }
 0x337   :  { %v519_v60 = vpop.f32.mrb[2].mxu0 }
 0x338   :  { %v413_v61 = vpop.f32.mrb[3].mxu0 }
 0x339   :  { %424 = vrot.lane.b32.xlu1 %v413_v61, %s599_s30 }
 0x33d   :  { %426 = vrot.lane.b32.xlu1 %v519_v60, %s599_s30 }
 0x341   :  { %241 = vperm.xlu1 %536, %v233_v63  }
 0x362   :  { %v237_v3 = vpop.permute.xlu0 %236 }
 0x363   :  { %v244_v4 = vmul.f32 %v237_v3, %v637_v0  ;;  %v245_v6 = vmul.f32 %v237_v3, %v639_v1 }
 0x365   :  { %248 = vst [vmem:[#allocation5] sm:$0xff] %v244_v4  ;;  %249 = vst [vmem:[#allocation5 + $0x8] sm:$0xff] %v245_v6 }
 0x3ab   :  { %v425_v7 = vpop.permute.xlu1 %424 }
 0x3ac   :  { %v430_v8 = vadd.f32 %v425_v7, %v413_v61 }
 0x3ae   :  { %v432_v9 = vand.u32 2147483647, %v430_v8 }
 0x3af   :  { %v427_v13 = vpop.permute.xlu1 %426 }
 0x3b0   :  { %v434_v15 = vadd.f32 1.0, %v432_v9  ;;  %v431_v16 = vadd.f32 %v519_v60, %v427_v13 }
 0x3b2   :  { %541 = vrcp.f32 %v434_v15  ;;  %v433_v17 = vand.u32 2147483647, %v431_v16 }
 0x3b4   :  { %v435_v18 = vadd.f32 1.0, %v433_v17 }
 0x3b6   :  { %543 = vrcp.f32 %v435_v18 }
 0x3bc   :  { %v542_v19 = vpop.eup %541 }
 0x3bd   :  { %v437_v20 = vmul.f32 %v542_v19, %v430_v8 }
 0x3bf   :  { %442 = vperm.xlu1 %536, %v437_v20  }
 0x3c0   :  { %v544_v21 = vpop.eup %543  ;;  %v242_v22 = vpop.permute.xlu1 %241 }
 0x3c1   :  { %v439_v0 = vmul.f32 %v544_v21, %v431_v16  ;;  %v246_v1 = vmul.f32 %v242_v22, %v641_v2  ;;  %v247_v23 = vmul.f32 %v242_v22, %v647_v5 }
 0x3c3   :  { %250 = vst [vmem:[#allocation5 + $0x10] sm:$0xff] %v246_v1  ;;  %251 = vst [vmem:[#allocation5 + $0x18] sm:$0xff] %v247_v23  ;;  %447 = vperm.xlu0 %535, %v439_v0  }
 0x43e   :  { %v443_v24 = vpop.permute.xlu1 %442 }
 0x43f   :  { %v450_v25 = vmul.f32 %v443_v24, %v658_v12  ;;  %v451_v26 = vmul.f32 %v443_v24, %v662_v14 }
 0x441   :  { %455 = vst [vmem:[#allocation5 + $0x20] sm:$0xff] %v450_v25  ;;  %456 = vst [vmem:[#allocation5 + $0x28] sm:$0xff] %v451_v26 }
 0x442   :  { %v448_v27 = vpop.permute.xlu0 %447 }
 0x443   :  { %v452_v28 = vmul.f32 %v448_v27, %v654_v10  ;;  %v453_v29 = vmul.f32 %v448_v27, %v656_v11 }
 0x445   :  { %457 = vst [vmem:[#allocation5 + $0x30] sm:$0xff] %v452_v28  ;;  %458 = vst [vmem:[#allocation5 + $0x38] sm:$0xff] %v453_v29 }
 0x446   :  { %578 = shalt.err (!%p575_p12)
}
 0x447   :  { %s579_s8 = scalar_lea.hbm %s720_s3, 1024 }
 0x448   :  { %p580_p13 = scmp.ne.s32.totalorder %s720_s3, %s579_s8  ;;  %p583_p0 = scmp.lt.u32.totalorder %s579_s8, %s720_s3 }
 0x44a   :  { %p585_p1 = pnand %p583_p0, %p580_p13 }
 0x44c   :  { %588 = shalt.err (!%p585_p1)
}
 0x44d   :  { %470 = dma.vmem_to_hbm [thread:$0]  %s465_s4, 1024, %s720_s3, [#allocation4], %s594_s22, %s594_s22, %s595_s23  }
 0x44e   :  { %591 = dma.done.wait [#allocation4], 1024  }
 0x44f   :  { %592 = vsyncadd [#allocation4], 4294966272 }
 0x450   :  { %474 = vsyncpa [#allocation3], 1 }
 0x451   :  { %475 = vsyncpa [#allocation4], 1 }

</bundles_post_ra>
